<compile_context>
chip_gen: v7x
topology: tpu7x:2x2x1
jax: 0.10.0
libtpu: 0.0.40
codegen_flags: <defaults>
</compile_context>

<pallas_src>
import functools

import jax
import jax.numpy as jnp
from jax.experimental import pallas as pl
from jax.experimental.pallas import tpu as pltpu

_VMEM_BUDGET_BYTES = 10 << 20  # input (double-buffered) + f32 accumulator


def _round_up(x: int, m: int) -> int:
    return ((x + m - 1) // m) * m


def _round_down(x: int, m: int) -> int:
    return (x // m) * m


def _abs_sum_kernel(x_ref, out_ref, acc_ref, *, n_rows, tile_rows, need_mask):
    """Accumulate sum(|x|) over row tiles of a 2-D array.

    x_ref  : VMEM (tile_rows, D)  -- one row block, source dtype (f32/bf16)
    out_ref: SMEM (1, 1) f32      -- scalar result: sum(|x|)
    acc_ref: VMEM (tile_rows, D) f32 -- elementwise running accumulator
    """
    i = pl.program_id(0)

    @pl.when(i == 0)
    def _():
        acc_ref[...] = jnp.zeros_like(acc_ref)

    # abs in the source dtype (cheap VPU), widen only for accumulation.
    x_abs = jnp.abs(x_ref[...]).astype(jnp.float32)

    if need_mask:
        # Only emitted when B % tile_rows != 0: zero out the rows of the last
        # (padded) block that lie past the real array (their contents are
        # unspecified).  Pure VPU compare + select, hidden under the DMA.
        row_ids = jax.lax.broadcasted_iota(jnp.int32, x_abs.shape, 0)
        valid_rows = n_rows - i * tile_rows
        x_abs = jnp.where(row_ids < valid_rows, x_abs, 0.0)

    acc_ref[...] += x_abs

    @pl.when(i == pl.num_programs(0) - 1)
    def _():
        # Single cross-lane/sublane reduce for the whole kernel.
        out_ref[0, 0] = jnp.sum(acc_ref[...])


def _abs_sum_2d(reps: jax.Array, block_rows: int | None = None) -> jax.Array:
    """sum(|reps|) over all elements of a 2-D array, as a Pallas TPU reduction."""
    B, D = reps.shape
    itemsize = jnp.dtype(reps.dtype).itemsize

    # VMEM footprint per row (lanes padded to a multiple of 128).
    lanes_padded = _round_up(D, 128)
    row_in_bytes = lanes_padded * itemsize
    row_acc_bytes = lanes_padded * 4
    # Budget: 2 * tile_rows * row_in (double-buffered input) + tile_rows * row_acc.
    tile_cap = max(8, _VMEM_BUDGET_BYTES // (2 * row_in_bytes + row_acc_bytes))
    if block_rows is not None:
        tile_cap = block_rows

    if tile_cap >= B:
        tile_rows = B                     # single full block (any B allowed)
    else:
        tile_rows = max(8, _round_down(tile_cap, 8))   # partial blocks: multiple of 8

    num_steps = pl.cdiv(B, tile_rows)
    need_mask = (B % tile_rows) != 0      # static: mask code only if ragged

    kernel = functools.partial(
        _abs_sum_kernel, n_rows=B, tile_rows=tile_rows, need_mask=need_mask
    )

    out = pl.pallas_call(
        kernel,
        out_shape=jax.ShapeDtypeStruct((1, 1), jnp.float32),
        grid_spec=pltpu.PrefetchScalarGridSpec(
            num_scalar_prefetch=0,
            grid=(num_steps,),
            in_specs=[pl.BlockSpec((tile_rows, D), lambda i: (i, 0))],
            out_specs=pl.BlockSpec(
                (1, 1), lambda i: (0, 0), memory_space=pltpu.MemorySpace.SMEM
            ),
            scratch_shapes=[pltpu.VMEM((tile_rows, D), jnp.float32)],
        ),
        compiler_params=pltpu.CompilerParams(
            dimension_semantics=("arbitrary",),   # single (reduction) grid axis
        ),
    )(reps)

    return out[0, 0]


def l1_regularization(reps: jax.Array, current_alpha: float) -> jax.Array:
    """current_alpha * mean over rows of (sum over dim=1 of |reps|)."""
    assert reps.ndim == 2, "L1Regularizer expects a 2-D input"
    n_rows = reps.shape[0]
    s = _abs_sum_2d(reps)
    # alpha and the mean's 1/n_rows applied outside the kernel.
    return jnp.asarray(current_alpha, jnp.float32) * (s / jnp.float32(n_rows))


class L1Regularizer:
    """JAX/Pallas port of the PyTorch L1Regularizer (warm-up state on host)."""

    # TODO(synk): warm-up .step() state (current_step / current_alpha) is pure
    # Python host state, as in the PyTorch module; no Pallas equivalent needed.
    def __init__(self, T: int = 5000, alpha: float = 0.01):
        self.T = T
        self.max_alpha = alpha
        self.current_step = 0
        self.current_alpha = 0.0

    def __call__(self, reps: jax.Array) -> jax.Array:
        l1_reg = l1_regularization(reps, self.current_alpha)
        self.step()
        return l1_reg

    def step(self):
        if self.current_step < self.T:
            self.current_step += 1
            self.current_alpha = (self.current_step / self.T) ** 2 * self.max_alpha


if __name__ == "__main__":
    key = jax.random.PRNGKey(0)
    B, D = 16, 32  # small 2-D "reps" batch (batch x hidden)
    reps = jax.random.normal(key, (B, D), dtype=jnp.float32)

    reg = L1Regularizer(T=5000, alpha=0.01)

    # First call: current_alpha == 0 -> result must be exactly 0.
    out0 = jax.block_until_ready(reg(reps))
    # Second call: current_alpha == (1/5000)**2 * 0.01
    out1 = jax.block_until_ready(reg(reps))

    # Reference in plain JAX (matches torch semantics).
    def ref(r, alpha):
        return alpha * jnp.mean(jnp.sum(jnp.abs(r), axis=1))

    ref0 = ref(reps, 0.0)
    ref1 = ref(reps, (1 / 5000) ** 2 * 0.01)
    assert jnp.allclose(out0, ref0, rtol=1e-6, atol=1e-9), (out0, ref0)
    assert jnp.allclose(out1, ref1, rtol=1e-6, atol=1e-9), (out1, ref1)

    # bf16 input, odd shape, single full block.
    reps_bf16 = jax.random.normal(jax.random.PRNGKey(1), (13, 200), jnp.bfloat16)
    out_b = jax.block_until_ready(l1_regularization(reps_bf16, 0.01))
    ref_b = 0.01 * jnp.mean(jnp.sum(jnp.abs(reps_bf16.astype(jnp.float32)), axis=1))
    assert jnp.allclose(out_b, ref_b, rtol=1e-2), (out_b, ref_b)

    # Force the multi-block + ragged-tail (masked) path: 13 rows, 8-row tiles.
    reps_tail = jax.random.normal(jax.random.PRNGKey(2), (13, 200), jnp.float32)
    s_tail = jax.block_until_ready(_abs_sum_2d(reps_tail, block_rows=8))
    s_ref = jnp.sum(jnp.abs(reps_tail))
    assert jnp.allclose(s_tail, s_ref, rtol=1e-6), (s_tail, s_ref)

    print("KERNEL_OK")
</pallas_src>

<mosaic_0001>
module attributes {stable_mosaic.version = 11 : i64} {
  func.func @_abs_sum_kernel(%arg0: i32, %arg1: memref<16x32xf32, #tpu.memory_space<vmem>>, %arg2: memref<1x1xf32, #tpu.memory_space<smem>>, %arg3: memref<16x32xf32, #tpu.memory_space<vmem>>) attributes {dimension_semantics = [#tpu.dimension_semantics<arbitrary>], iteration_bounds = array<i64: 1>, scalar_prefetch = 0 : i64, scratch_operands = 1 : i64, tpu.core_type = #tpu.core_type<tc>, window_params = [{transform_indices = @transform_0, window_bounds = array<i64: 16, 32>}, {transform_indices = @transform_1, window_bounds = array<i64: 1, 1>}]} {
    %c0_i32 = arith.constant 0 : i32
    %0 = arith.cmpi eq, %arg0, %c0_i32 : i32
    %1 = arith.extui %0 : i1 to i32
    %c0_i32_0 = arith.constant 0 : i32
    %2 = arith.cmpi ne, %1, %c0_i32_0 : i32
    scf.if %2 {
      %cst = arith.constant 0.000000e+00 : f32
      %11 = vector.broadcast %cst : f32 to vector<16x32xf32>
      %c0_8 = arith.constant 0 : index
      %c0_9 = arith.constant 0 : index
      %12 = vector.load %arg3[%c0_8, %c0_9] : memref<16x32xf32, #tpu.memory_space<vmem>>, vector<16x32xf32>
      tpu.vector_store %arg3[%c0_8, %c0_9], %11 {strides = array<i32>} : memref<16x32xf32, #tpu.memory_space<vmem>>, vector<16x32xf32>,
    } else {
    }
    %c0 = arith.constant 0 : index
    %c0_1 = arith.constant 0 : index
    %3 = vector.load %arg1[%c0, %c0_1] : memref<16x32xf32, #tpu.memory_space<vmem>>, vector<16x32xf32>
    %4 = math.absf %3 : vector<16x32xf32>
    %c0_2 = arith.constant 0 : index
    %c0_3 = arith.constant 0 : index
    %5 = vector.load %arg3[%c0_2, %c0_3] : memref<16x32xf32, #tpu.memory_space<vmem>>, vector<16x32xf32>
    %6 = arith.addf %5, %4 : vector<16x32xf32>
    %c0_4 = arith.constant 0 : index
    %c0_5 = arith.constant 0 : index
    %7 = vector.load %arg3[%c0_4, %c0_5] : memref<16x32xf32, #tpu.memory_space<vmem>>, vector<16x32xf32>
    tpu.vector_store %arg3[%c0_4, %c0_5], %6 {strides = array<i32>} : memref<16x32xf32, #tpu.memory_space<vmem>>, vector<16x32xf32>,
    %c0_i32_6 = arith.constant 0 : i32
    %8 = arith.cmpi eq, %arg0, %c0_i32_6 : i32
    %9 = arith.extui %8 : i1 to i32
    %c0_i32_7 = arith.constant 0 : i32
    %10 = arith.cmpi ne, %9, %c0_i32_7 : i32
    scf.if %10 {
      %c0_8 = arith.constant 0 : index
      %c0_9 = arith.constant 0 : index
      %11 = vector.load %arg3[%c0_8, %c0_9] : memref<16x32xf32, #tpu.memory_space<vmem>>, vector<16x32xf32>
      %12 = vector.shape_cast %11 : vector<16x32xf32> to vector<1x16x32xf32>
      %cst = arith.constant dense<0.000000e+00> : vector<1xf32>
      %13 = vector.multi_reduction <add>, %12, %cst [1, 2] : vector<1x16x32xf32> to vector<1xf32>
      %14 = vector.shape_cast %13 : vector<1xf32> to vector<1x1x1xf32>
      %15 = vector.extract %14[0, 0, 0] : f32 from vector<1x1x1xf32>
      %c0_10 = arith.constant 0 : index
      %c0_11 = arith.constant 0 : index
      %16 = memref.load %arg2[%c0_10, %c0_11] : memref<1x1xf32, #tpu.memory_space<smem>>
      memref.store %15, %arg2[%c0_10, %c0_11] : memref<1x1xf32, #tpu.memory_space<smem>>
    } else {
    }
    return
  }
  func.func @transform_0(%arg0: i32) -> (i32, i32) {
    %c0_i32 = arith.constant 0 : i32
    %c0_i32_0 = arith.constant 0 : i32
    return %arg0, %c0_i32 : i32, i32
  }
  func.func @transform_1(%arg0: i32) -> (i32, i32) {
    %c0_i32 = arith.constant 0 : i32
    %c0_i32_0 = arith.constant 0 : i32
    %c0_i32_1 = arith.constant 0 : i32
    return %c0_i32, %c0_i32_0 : i32, i32
  }
}

</mosaic_0001>

<bundles_post_ra>
// kernel: tpu_custom_call.1
= control target key start
LH: loop header
LB: loop body
LE: loop exit
PB: predicated region body
PF: predicated region fallthrough
CT: control target
= control target key end

     0   :  { %6 = vsyncpa [#allocation4], 0  ;;  %s162_s0 = inlined_call_operand.hbm [shape: f32[16,32], index: 0, kind: input, shape index: {}]   ;;  %s163_s1 = inlined_call_operand.hbm [shape: f32[1,1], index: 1, kind: output, shape index: {}]  }
   0x1   :  { %7 = vsyncpa [#allocation5], 0  ;;  %s117_s6 = smov [#allocation3]   ;;  %s81_s10 = scalar_lea.hbm %s162_s0, 256 }
   0x2   :  { %s13_s7 = sshll.u32 %s117_s6, 4  ;;  %p82_p0 = scmp.ne.s32.totalorder %s162_s0, %s81_s10  ;;  %s14_s7 = int_to_ptr.vmem [resolvable:$true] %s13_s7 }
   0x3   :  { %p85_p1 = scmp.lt.u32.totalorder %s81_s10, %s162_s0 }
   0x5   :  { %p87_p2 = pnand %p85_p1, %p82_p0 }
   0x7   :  { %90 = shalt.err (!%p87_p2)
}
   0x8   :  { %s91_s15 = scalar_lea.vmem %s14_s7, 256  ;;  %p96_p4 = scmp.lt.s32.totalorder %s14_s7, %s14_s7 }
   0x9   :  { %p92_p3 = scmp.ne.s32.totalorder %s14_s7, %s91_s15  ;;  %p97_p5 = scmp.lt.s32.totalorder %s91_s15, %s91_s15 }
   0xb   :  { %p98_p6 = por %p97_p5, %p96_p4 }
   0xd   :  { %p99_p7 = pnand %p98_p6, %p92_p3 }
   0xf   :  { %102 = shalt.err (!%p99_p7)
}
  0x10   :  { %s118_s16 = smov 128   ;;  %s119_s17 = smov 8  }
  0x11   :  { %19 = dma.hbm_to_vmem [thread:$0]  %s162_s0, 256, %s14_s7, [#allocation4], %s118_s16, %s118_s16, %s119_s17  }
  0x12   :  { %113 = dma.done.wait [#allocation4], 256  }
  0x13   :  { %114 = vsyncadd [#allocation4], 4294967040  ;;  %vm27_vm0 = vcmask 261120   ;;  %v120_v0 = vmov 0.0   ;;  %v30_v1 = vld [vmem:[#allocation3] sm:$0xff]  ;;  %v31_v2 = vld [vmem:[#allocation3 + $0x8] sm:$0xff] }
  0x14   :  { %28 = vst.msk [vmem:[#allocation2] sm:$0xff] %vm27_vm0, %v120_v0  ;;  %29 = vst.msk [vmem:[#allocation2 + $0x8] sm:$0xff] %vm27_vm0, %v120_v0  ;;  %v32_v3 = vand.u32 2147483647, %v30_v1  ;;  %v33_v4 = vand.u32 2147483647, %v31_v2 }
  0x15   :  { %s103_s22 = scalar_lea.hbm %s163_s1, 16 }
  0x16   :  { %p104_p8 = scmp.ne.s32.totalorder %s163_s1, %s103_s22  ;;  %p107_p9 = scmp.lt.u32.totalorder %s103_s22, %s163_s1 }
  0x18   :  { %p109_p10 = pnand %p107_p9, %p104_p8 }
  0x1b   :  { %v34_v5 = vld [vmem:[#allocation2] sm:$0xff]  ;;  %v35_v6 = vld [vmem:[#allocation2 + $0x8] sm:$0xff] }
  0x1c   :  { %v36_v7 = vadd.f32 %v34_v5, %v32_v3  ;;  %v37_v8 = vadd.f32 %v35_v6, %v33_v4 }
  0x1e   :  { %39 = vst.msk [vmem:[#allocation2] sm:$0xff] %vm27_vm0, %v36_v7  ;;  %40 = vst.msk [vmem:[#allocation2 + $0x8] sm:$0xff] %vm27_vm0, %v37_v8 }
  0x25   :  { %v44_v9 = vld [vmem:[#allocation2] sm:$0xff]  ;;  %v45_v10 = vld [vmem:[#allocation2 + $0x8] sm:$0xff] }
  0x26   :  { %v46_v11 = vsel %vm27_vm0, %v44_v9, 0.0  ;;  %v47_v12 = vsel %vm27_vm0, %v45_v10, 0.0 }
  0x27   :  { %v48_v13 = vadd.f32 %v47_v12, %v46_v11 }
  0x29   :  { %49 = vadd.xlane.f32.xlu0 %v48_v13 }
  0xb6   :  { %v50_v14 = vpop.xlane.xlu0 %49 }
  0xb7   :  { %v51_v15 = vrot.slane %v50_v14, 4 }
  0xb9   :  { %v52_v16 = vadd.f32 %v51_v15, %v50_v14 }
  0xbb   :  { %v53_v17 = vrot.slane %v52_v16, 2 }
  0xbd   :  { %v54_v18 = vadd.f32 %v53_v17, %v52_v16 }
  0xbf   :  { %v55_v19 = vrot.slane %v54_v18, 1 }
  0xc1   :  { %v56_v20 = vadd.f32 %v55_v19, %v54_v18 }
  0xc3   :  { %74 = vpush %v56_v20 }
  0xf4   :  { %s75_s0 = spop %74 }
  0xf5   :  { %59 = sst [smem:[#allocation6]] %s75_s0 }
  0xf6   :  { %112 = shalt.err (!%p109_p10)
}
  0xf7   :  { %s121_s27 = smov [#allocation6]  }
  0xf8   :  { %67 = dma.smem_to_hbm %s121_s27, 16, %s163_s1, [#allocation5]  }
  0xf9   :  { %115 = dma.done.wait [#allocation5], 16  }
  0xfa   :  { %116 = vsyncadd [#allocation5], 4294967280 }
  0xfb   :  { %71 = sfence }
  0xfc   :  { %72 = vsyncpa [#allocation4], 1 }
  0xfd   :  { %73 = vsyncpa [#allocation5], 1 }

</bundles_post_ra>
